<compile_context>
chip_gen: v6e
topology: v6e:2x2x1
jax: 0.10.0
libtpu: 0.0.40
codegen_flags: <defaults>
</compile_context>

<pallas_src>
import functools

import jax
import jax.numpy as jnp
from jax import lax
from jax.experimental import pallas as pl
from jax.experimental.pallas import tpu as pltpu

LANE = 128


def _round_up(a, b):
    return -(-a // b) * b


def _soft_ce_kernel(x_ref, t_ref, o_ref, *, valid_p, block_p):
    # x_ref/t_ref: (1, C, T_P) blocks; o_ref: (1, 1, 1, 128).
    x = x_ref[0].astype(jnp.float32)                                 # (C, T_P)
    t = t_ref[0].astype(jnp.float32)                                 # (C, T_P)

    # Stable log-sum-exp over channels (small cross-sublane reduce; the op is
    # memory-bound so the XLU work is hidden under the DMA).
    m = jnp.max(x, axis=0, keepdims=True)                            # (1, T_P)
    lse = jnp.log(jnp.sum(jnp.exp(x - m), axis=0, keepdims=True)) + m

    # Direct, well-conditioned form of sum_c (-log_softmax) * t.
    pp = jnp.sum(t * (lse - x), axis=0, keepdims=True)               # (1, T_P)

    # Mask pixels past the true extent (ragged last block).  jnp.where is a
    # select, so garbage (inf/nan) in out-of-range lanes does not propagate.
    lane = lax.broadcasted_iota(jnp.int32, pp.shape, dimension=1)
    gidx = pl.program_id(1) * block_p + lane
    pp = jnp.where(gidx < valid_p, pp, 0.0)

    partial = jnp.sum(pp)                                            # scalar
    # Lane-dense (128-wide) unmasked store of the per-block partial.
    o_ref[...] = jnp.full(o_ref.shape, partial, dtype=o_ref.dtype)


def soft_cross_entropy_loss_2d(inputs, targets, *,
                               vmem_budget_bytes=32 * 1024 * 1024):
    N, C, H, W = inputs.shape
    tH, tW = targets.shape[2], targets.shape[3]
    P = H * W

    # Native layout: free (contiguous) reshape, no HBM relayout / padding.
    x = inputs.reshape(N, C, P)
    t = targets.reshape(N, C, P)

    itx = jnp.dtype(inputs.dtype).itemsize
    itt = jnp.dtype(targets.dtype).itemsize

    def _sublane_padded_rows(c, itemsize):
        # 8 rows/vreg for 32-bit, 16 for bf16, 32 for int8/fp8.
        return _round_up(c, 8 * (4 // itemsize))

    c8 = _round_up(C, 8)
    # VMEM bytes per unit of T_P:
    #   - 2 input arrays x 2 pipeline buffers (sublane-padded, real itemsize)
    #   - in-kernel f32 working set: x/t upcasts, exp(x-m), t*(lse-x), plus
    #     a handful of (1, T_P) row temporaries.
    per_tp_bytes = (2 * (_sublane_padded_rows(C, itx) * itx
                         + _sublane_padded_rows(C, itt) * itt)
                    + (4 * c8 + 8) * 4)
    cap = max(LANE, (vmem_budget_bytes // per_tp_bytes) // LANE * LANE)

    if P <= cap:
        tp = P                      # single block = full pixel axis (always legal)
    else:
        tp = cap                    # multiple of 128 (lane-dense blocks)
    nb = pl.cdiv(P, tp)

    # Keep at least 2 parallel grid points when there is enough work so both
    # v7x TensorCores are busy (harmless on v5e/v6e).
    if N * nb < 2 and P >= 2 * LANE:
        tp = _round_up(pl.cdiv(P, 2), LANE)
        nb = pl.cdiv(P, tp)

    # VMEM limit tied to the actual footprint (+25% headroom).  With the
    # default budget this stays well under v7x's 64 MiB per TensorCore.
    footprint = per_tp_bytes * tp + 64 * 1024
    vmem_limit = int(min(max(footprint * 5 // 4, 16 * 1024 * 1024),
                         112 * 1024 * 1024))

    cost = pl.CostEstimate(
        flops=6 * N * C * P,
        transcendentals=(C + 1) * N * P,
        bytes_accessed=N * C * P * (itx + itt) + N * nb * LANE * 4,
    )

    kernel = functools.partial(_soft_ce_kernel, valid_p=P, block_p=tp)

    partials = pl.pallas_call(
        kernel,
        out_shape=jax.ShapeDtypeStruct((N, nb, 1, LANE), jnp.float32),
        grid=(N, nb),
        in_specs=[
            pl.BlockSpec((1, C, tp), lambda n, p: (n, 0, p)),
            pl.BlockSpec((1, C, tp), lambda n, p: (n, 0, p)),
        ],
        out_specs=pl.BlockSpec((1, 1, 1, LANE), lambda n, p: (n, p, 0, 0)),
        compiler_params=pltpu.CompilerParams(
            dimension_semantics=("parallel", "parallel"),
            vmem_limit_bytes=vmem_limit,
        ),
        cost_estimate=cost,
    )(x, t)

    # Every lane of a block holds the same partial -> take lane 0, sum, and
    # apply the single 1/(H_t*W_t) scale (matches the per-sample division).
    loss = jnp.sum(partials[..., 0]) * (1.0 / float(tH * tW))
    # PyTorch forward returns a (1, 1, 1, 1) tensor.
    return loss.reshape(1, 1, 1, 1)


def _reference(inputs, targets):
    logp = jax.nn.log_softmax(inputs.astype(jnp.float32), axis=1)
    tH, tW = targets.shape[2], targets.shape[3]
    per_sample = jnp.sum(-logp * targets.astype(jnp.float32),
                         axis=(1, 2, 3)) / (tH * tW)
    return jnp.sum(per_sample).reshape(1, 1, 1, 1)


if __name__ == "__main__":
    key = jax.random.PRNGKey(0)
    k1, k2 = jax.random.split(key)

    N, C, H, W = 2, 4, 16, 16
    inputs = jax.random.normal(k1, (N, C, H, W), dtype=jnp.float32)
    # Soft targets: per-pixel distributions over channels.
    targets = jax.nn.softmax(
        jax.random.normal(k2, (N, C, H, W), dtype=jnp.float32), axis=1)

    loss = jax.block_until_ready(soft_cross_entropy_loss_2d(inputs, targets))

    ref = _reference(inputs, targets)
    assert loss.shape == (1, 1, 1, 1)
    assert jnp.allclose(loss, ref, rtol=1e-5, atol=1e-5), (loss, ref)

    print("KERNEL_OK")
</pallas_src>

<mosaic_0001>
module attributes {stable_mosaic.version = 11 : i64} {
  func.func @_soft_ce_kernel(%arg0: i32, %arg1: i32, %arg2: memref<1x4x256xf32, #tpu.memory_space<vmem>>, %arg3: memref<1x4x256xf32, #tpu.memory_space<vmem>>, %arg4: memref<1x1x1x128xf32, #tpu.memory_space<vmem>>) attributes {dimension_semantics = [#tpu.dimension_semantics<parallel>, #tpu.dimension_semantics<parallel>], iteration_bounds = array<i64: 2, 1>, scalar_prefetch = 0 : i64, scratch_operands = 0 : i64, tpu.core_type = #tpu.core_type<tc>, window_params = [{transform_indices = @transform_0, window_bounds = array<i64: 1, 4, 256>}, {transform_indices = @transform_1, window_bounds = array<i64: 1, 4, 256>}, {transform_indices = @transform_2, window_bounds = array<i64: 1, 1, 1, 128>}]} {
    %c0 = arith.constant 0 : index
    %c0_0 = arith.constant 0 : index
    %c0_1 = arith.constant 0 : index
    %0 = vector.load %arg2[%c0, %c0_0, %c0_1] : memref<1x4x256xf32, #tpu.memory_space<vmem>>, vector<1x4x256xf32>
    %1 = vector.shape_cast %0 : vector<1x4x256xf32> to vector<4x256xf32>
    %c0_2 = arith.constant 0 : index
    %c0_3 = arith.constant 0 : index
    %c0_4 = arith.constant 0 : index
    %2 = vector.load %arg3[%c0_2, %c0_3, %c0_4] : memref<1x4x256xf32, #tpu.memory_space<vmem>>, vector<1x4x256xf32>
    %3 = vector.shape_cast %2 : vector<1x4x256xf32> to vector<4x256xf32>
    %cst = arith.constant dense<0xFF800000> : vector<256xf32>
    %4 = vector.multi_reduction <maximumf>, %1, %cst [0] : vector<4x256xf32> to vector<256xf32>
    %5 = vector.shape_cast %4 : vector<256xf32> to vector<1x256xf32>
    %6 = vector.broadcast %5 : vector<1x256xf32> to vector<4x256xf32>
    %7 = arith.subf %1, %6 : vector<4x256xf32>
    %8 = math.exp %7 : vector<4x256xf32>
    %cst_5 = arith.constant dense<0.000000e+00> : vector<256xf32>
    %9 = vector.multi_reduction <add>, %8, %cst_5 [0] : vector<4x256xf32> to vector<256xf32>
    %10 = vector.shape_cast %9 : vector<256xf32> to vector<1x256xf32>
    %11 = math.log %10 : vector<1x256xf32>
    %12 = arith.addf %11, %5 : vector<1x256xf32>
    %13 = vector.broadcast %12 : vector<1x256xf32> to vector<4x256xf32>
    %14 = arith.subf %13, %1 : vector<4x256xf32>
    %15 = arith.mulf %3, %14 : vector<4x256xf32>
    %cst_6 = arith.constant dense<0.000000e+00> : vector<256xf32>
    %16 = vector.multi_reduction <add>, %15, %cst_6 [0] : vector<4x256xf32> to vector<256xf32>
    %17 = vector.shape_cast %16 : vector<256xf32> to vector<1x256xf32>
    %18 = tpu.iota {dimensions = array<i32: 1>} : vector<1x256xi32>
    %c256_i32 = arith.constant 256 : i32
    %19 = arith.muli %arg1, %c256_i32 : i32
    %20 = vector.broadcast %19 : i32 to vector<1x256xi32>
    %21 = arith.addi %20, %18 : vector<1x256xi32>
    %c256_i32_7 = arith.constant 256 : i32
    %22 = vector.broadcast %c256_i32_7 : i32 to vector<1x256xi32>
    %23 = arith.cmpi slt, %21, %22 : vector<1x256xi32>
    %cst_8 = arith.constant 0.000000e+00 : f32
    %24 = vector.broadcast %cst_8 : f32 to vector<1x256xf32>
    %25 = arith.select %23, %17, %24 : vector<1x256xi1>, vector<1x256xf32>
    %26 = vector.shape_cast %25 : vector<1x256xf32> to vector<1x1x256xf32>
    %cst_9 = arith.constant dense<0.000000e+00> : vector<1xf32>
    %27 = vector.multi_reduction <add>, %26, %cst_9 [1, 2] : vector<1x1x256xf32> to vector<1xf32>
    %28 = vector.shape_cast %27 : vector<1xf32> to vector<1x1x1xf32>
    %29 = vector.extract %28[0, 0, 0] : f32 from vector<1x1x1xf32>
    %30 = vector.broadcast %29 : f32 to vector<1x1x1x128xf32>
    %c0_10 = arith.constant 0 : index
    %c0_11 = arith.constant 0 : index
    %c0_12 = arith.constant 0 : index
    %c0_13 = arith.constant 0 : index
    %31 = vector.load %arg4[%c0_10, %c0_11, %c0_12, %c0_13] : memref<1x1x1x128xf32, #tpu.memory_space<vmem>>, vector<1x1x1x128xf32>
    tpu.vector_store %arg4[%c0_10, %c0_11, %c0_12, %c0_13], %30 {strides = array<i32>} : memref<1x1x1x128xf32, #tpu.memory_space<vmem>>, vector<1x1x1x128xf32>,
    return
  }
  func.func @transform_0(%arg0: i32, %arg1: i32) -> (i32, i32, i32) {
    %c0_i32 = arith.constant 0 : i32
    %c0_i32_0 = arith.constant 0 : i32
    return %arg0, %c0_i32, %arg1 : i32, i32, i32
  }
  func.func @transform_1(%arg0: i32, %arg1: i32) -> (i32, i32, i32) {
    %c0_i32 = arith.constant 0 : i32
    %c0_i32_0 = arith.constant 0 : i32
    return %arg0, %c0_i32, %arg1 : i32, i32, i32
  }
  func.func @transform_2(%arg0: i32, %arg1: i32) -> (i32, i32, i32, i32) {
    %c0_i32 = arith.constant 0 : i32
    %c0_i32_0 = arith.constant 0 : i32
    %c0_i32_1 = arith.constant 0 : i32
    return %arg0, %arg1, %c0_i32, %c0_i32_0 : i32, i32, i32, i32
  }
}

</mosaic_0001>

<bundles_post_ra>
// kernel: tpu_custom_call.1
= control target key start
LH: loop header
LB: loop body
LE: loop exit
PB: predicated region body
PF: predicated region fallthrough
CT: control target
= control target key end

     0   :  { %7 = vsyncpa [#allocation3], 0  ;;  %s870_s0 = inlined_call_operand.hbm [shape: f32[2,4,256], index: 0, kind: input, shape index: {}]   ;;  %s871_s1 = inlined_call_operand.hbm [shape: f32[2,4,256], index: 1, kind: input, shape index: {}]   ;;  %s872_s2 = inlined_call_operand.hbm [shape: f32[2,1,1,128], index: 2, kind: output, shape index: {}]  }
   0x1   :  { %9 = vsyncpa [#allocation3 + $0x1], 0 }
   0x2   :  { %10 = vsyncpa [#allocation6], 0 }
   0x3   :  { %12 = vsyncpa [#allocation6 + $0x1], 0 }
   0x4   :  { %13 = vsyncpa [#allocation4], 0 }
   0x5   :  { %15 = vsyncpa [#allocation4 + $0x1], 0  ;;  %s693_s9 = smov 0   ;;  %s695_s10 = smov 0  }
   0x6   :  { %s697_s11 = smov 0   ;;  %s699_s12 = smov 0  }
   0x7   :  { %s701_s13 = smov 0   ;;  %s703_s14 = smov 0  }
   0x8 LB: > { %s439_s15 = sadd.s32 4294967295, %s673_s14   ;;  %s440_s16 = sadd.s32 4294967294, %s673_s14   ;;  %s673_s14 = sphi %s703_s14, %s21_s14   ;;  %s669_s13 = sphi %s701_s13, %s884_s13   ;;  %s665_s12 = sphi %s699_s12, %s883_s12   ;;  %s661_s11 = sphi %s697_s11, %s882_s11   ;;  %s657_s10 = sphi %s695_s10, %s881_s10   ;;  %s653_s9 = sphi %s693_s9, %s880_s9  }
   0x9   : > { %s33_s17 = sadd.s32 1, %s669_s13  ;;  %s42_s18 = sadd.s32 1, %s661_s11 }
   0xa   : > { %p35_p0 = scmp.ge.s32.totalorder %s33_s17, 2  ;;  %p49_p1 = scmp.ne.s32.totalorder %s661_s11, %s657_s10 }
   0xb   : > { %p50_p2 = scmp.eq.s32.totalorder %s673_s14, 0  ;;  %p55_p3 = scmp.ne.s32.totalorder %s657_s10, %s653_s9 }
   0xc   : > { %s886_s17 = smov (%p35_p0, %s33_s17), 0  ;;  %p56_p5 = scmp.eq.s32.totalorder %s439_s15, 0 }
   0xd   : > { %p734_p4 = por %p50_p2, %p49_p1  ;;  %s37_s20 = ssub.s32 %s669_s13, %s886_s17 }
   0xe   : > { %p109_p6 = scmp.eq.s32.totalorder %s439_s15, 1  ;;  %p40_p7 = scmp.eq.s32.totalorder %s37_s20, 0 }
   0xf   : > { %p740_p8 = por %p56_p5, %p55_p3  ;;  %p115_p10 = scmp.eq.s32.totalorder %s440_s16, 1 }
  0x10   : > { %p744_p9 = por %p109_p6, %p49_p1  ;;  %p476_p13 = scmp.lt.s32.totalorder %s673_s14, 2 }
  0x11   : > { %s749_s23 = scalar_select %p40_p7, %s661_s11, %s42_s18  }
  0x12   : > { %p751_p11 = por %p115_p10, %p55_p3  ;;  %s758_s25 = sand.u32 1, %s661_s11  }
  0x13   : > { %s443_s26 = sshll.u32 %s758_s25, 3  ;;  %s455_s27 = sshll.u32 %s669_s13, 7 }
  0x14   : > { %s147_s30 = scalar_lea.hbm %s870_s0, %s455_s27  ;;  %s139_s3 = scalar_lea.vmem [#allocation2], %s443_s26 }
  0x15   : > { %s149_s4 = sshll.u32 %s139_s3, 4  ;;  %p767_p0 = pnand %p476_p13, %p734_p4  ;;  %s150_s4 = int_to_ptr.vmem [resolvable:$true] %s149_s4 }
  0x16   : > { %p449_p1 = scmp.ge.s32.totalorder %s673_s14, 1  ;;  %p175_p2 = scmp.lt.s32.totalorder %s673_s14, 3 }
  0x17   : > { %s136_s6 = scalar_lea.sflag [#allocation3], %s758_s25  ;;  %p535_p3 = pneg %p767_p0 }
  0x18   : > { %s546_s7 = scalar_lea.vmem %s150_s4, 128  ;;  %s675_s8 = smov [#allocation2]  }
  0x19   : > { %p547_p5 = scmp.ne.s32.totalorder %s150_s4, %s546_s7  ;;  %s551_s15 = sshll.u32 %s675_s8, 4  ;;  %s552_s15 = int_to_ptr.vmem [resolvable:$false] %s551_s15 }
  0x1a   : > { %s553_s16 = scalar_lea.vmem %s552_s15, 256  ;;  %p554_p4 = scmp.lt.s32.totalorder %s150_s4, %s552_s15 }
  0x1b   : > { %p549_p6 = pnand %p547_p5, %p535_p3  ;;  %p555_p10 = scmp.lt.s32.totalorder %s553_s16, %s546_s7 }
  0x1d   : > { %p550_p7 = pneg %p549_p6  ;;  %p556_p13 = por %p555_p10, %p554_p4 }
  0x1f   : > { %p557_p12 = pnand %p556_p13, %p550_p7 }
  0x21   : > { %560 = shalt.err (!%p557_p12)
}
  0x22   : > { %468 = dma.hbm_to_vmem [thread:$0]  (!%p767_p0), %s147_s30, 128, %s150_s4, %s136_s6  }
  0x23   : > { %p785_p5 = pnand %p449_p1, %p175_p2  ;;  %s168_s28 = scalar_lea.hbm %s871_s1, %s455_s27 }
  0x24   : > { %s160_s29 = scalar_lea.vmem [#allocation5], %s443_s26  ;;  %s157_s7 = scalar_lea.sflag [#allocation6], %s758_s25 }
  0x25   : > { %s170_s3 = sshll.u32 %s160_s29, 4  ;;  %s676_s30 = smov [#allocation5]   ;;  %s171_s3 = int_to_ptr.vmem [resolvable:$true] %s170_s3 }
  0x26   : > { %s574_s8 = scalar_lea.vmem %s171_s3, 128  ;;  %s579_s4 = sshll.u32 %s676_s30, 4  ;;  %s580_s4 = int_to_ptr.vmem [resolvable:$false] %s579_s4 }
  0x27   : > { %p575_p12 = scmp.ne.s32.totalorder %s171_s3, %s574_s8  ;;  %s581_s6 = scalar_lea.vmem %s580_s4, 256 }
  0x28   : > { %p582_p1 = scmp.lt.s32.totalorder %s171_s3, %s580_s4  ;;  %p583_p2 = scmp.lt.s32.totalorder %s581_s6, %s574_s8 }
  0x29   : > { %p577_p6 = pnand %p575_p12, %p535_p3 }
  0x2a   : > { %p584_p4 = por %p583_p2, %p582_p1 }
  0x2b   : > { %p578_p7 = pneg %p577_p6 }
  0x2d   : > { %p585_p10 = pnand %p584_p4, %p578_p7 }
  0x2f   : > { %588 = shalt.err (!%p585_p10)
}
  0x30   : > { %471 = dma.hbm_to_vmem [thread:$0]  (!%p767_p0), %s168_s28, 128, %s171_s3, %s157_s7  }
  0x31   : > { %179 = sbr.rel (%p785_p5) target bundleno = 364 (0x16c), region = 28  ;;  %s801_s25 = sand.u32 (!%p785_p5), 1, %s657_s10  }
  0x32   : > { %s450_s26 = sshll.u32 (!%p785_p5), %s801_s25, 3  ;;  %s182_s27 = scalar_lea.sflag (!%p785_p5), [#allocation3], %s801_s25 }
  0x33   : > { %s185_s15 = scalar_lea.vmem (!%p785_p5), [#allocation2], %s450_s26 }
  0x36   : > { %640 = dma.done.wait (%p740_p8), %s182_s27, 128  }
  0x37   : > { %642 = vsyncadd (%p740_p8), %s182_s27, 4294967168  ;;  %s191_s5 = scalar_lea.sflag [#allocation6], %s801_s25  ;;  %s810_s16 = scalar_lea.vmem [#allocation5], %s450_s26 }
  0x38   : > { %644 = dma.done.wait (%p740_p8), %s191_s5, 128  }
  0x39   : > { %646 = vsyncadd (%p740_p8), %s191_s5, 4294967168  ;;  %vm226_vm0 = vcmask 1043456   ;;  %v221_v0 = vld [vmem:[%s185_s15] sm:$0xff]  ;;  %v222_v43 = vld [vmem:[%s810_s16] sm:$0xff]  ;;  %vm306_vm1 = vcmask 1040384   ;;  %s218_s21 = scalar_lea.vmem [#allocation7], %s801_s25 }
  0x3a   : > { %v224_v1 = vcombine.high %v221_v0, %v221_v0  ;;  %v227_v2 = vsel %vm226_vm0, %v221_v0, -inf  ;;  %s335_s18 = sshll.u32 %s218_s21, 4  ;;  %s452_s19 = sshll.u32 %s665_s12, 4  ;;  %s825_s18 = int_to_ptr.vmem [resolvable:$true] %s335_s18 }
  0x3b   : > { %v228_v3 = vrot.slane %v227_v2, 4  ;;  %s333_s3 = scalar_lea.hbm %s872_s2, %s452_s19  ;;  %s322_s7 = scalar_lea.sflag [#allocation4], %s801_s25 }
  0x3c   : > { %v234_v4 = vsel %vm226_vm0, %v224_v1, -inf  ;;  %s589_s8 = scalar_lea.vmem %s825_s18, 16  ;;  %s677_s30 = smov [#allocation7]  }
  0x3d   : > { %v229_v5 = vmax.f32 %v227_v2, %v228_v3  ;;  %v235_v6 = vrot.slane %v234_v4, 4  ;;  %p590_p8 = scmp.ne.s32.totalorder %s825_s18, %s589_s8  ;;  %s593_s12 = sshll.u32 %s677_s30, 4  ;;  %s594_s12 = int_to_ptr.vmem [resolvable:$false] %s593_s12 }
  0x3e   : > { %s595_s4 = scalar_lea.vmem %s594_s12, 32  ;;  %p596_p13 = scmp.lt.s32.totalorder %s825_s18, %s594_s12 }
  0x3f   : > { %v230_v7 = vrot.slane %v229_v5, 2  ;;  %v236_v8 = vmax.f32 %v234_v4, %v235_v6  ;;  %p591_p0 = pnand %p590_p8, %p744_p9  ;;  %p597_p5 = scmp.lt.s32.totalorder %s595_s4, %s589_s8 }
  0x41   : > { %v231_v9 = vmax.f32 %v229_v5, %v230_v7  ;;  %v237_v10 = vrot.slane %v236_v8, 2  ;;  %p592_p3 = pneg %p591_p0  ;;  %p598_p12 = por %p597_p5, %p596_p13 }
  0x43   : > { %v232_v11 = vrot.slane %v231_v9, 1  ;;  %v238_v12 = vmax.f32 %v236_v8, %v237_v10  ;;  %p599_p6 = pnand %p598_p12, %p592_p3 }
  0x45   : > { %v233_v13 = vmax.f32 %v231_v9, %v232_v11  ;;  %v239_v14 = vrot.slane %v238_v12, 1 }
  0x47   : > { %v240_v15 = vmax.f32 %v238_v12, %v239_v14 }
  0x49   : > { %v243_v16 = vcombine.low %v233_v13, %v240_v15 }
  0x4b   : > { %v245_v17 = vsub.f32 %v221_v0, %v243_v16 }
  0x4d   : > { %v246_v18 = vmul.f32 1.442695, %v245_v17 }
  0x4f   : > { %527 = vpow2.f32 %v246_v18 }
  0x5c   : > { %v528_v19 = vpop.eup %527 }
  0x5d   : > { %v249_v20 = vcombine.high %v528_v19, %v528_v19  ;;  %v251_v21 = vsel %vm226_vm0, %v528_v19, 0.0 }
  0x5e   : > { %v252_v22 = vrot.slane %v251_v21, 4 }
  0x5f   : > { %v258_v23 = vsel %vm226_vm0, %v249_v20, 0.0 }
  0x60   : > { %v253_v24 = vadd.f32 %v252_v22, %v251_v21  ;;  %v259_v25 = vrot.slane %v258_v23, 4 }
  0x62   : > { %v254_v26 = vrot.slane %v253_v24, 2  ;;  %v260_v27 = vadd.f32 %v259_v25, %v258_v23 }
  0x64   : > { %v255_v28 = vadd.f32 %v254_v26, %v253_v24  ;;  %v261_v29 = vrot.slane %v260_v27, 2 }
  0x66   : > { %v256_v30 = vrot.slane %v255_v28, 1  ;;  %v262_v31 = vadd.f32 %v261_v29, %v260_v27 }
  0x68   : > { %v257_v32 = vadd.f32 %v256_v30, %v255_v28  ;;  %v263_v33 = vrot.slane %v262_v31, 1 }
  0x6a   : > { %v264_v34 = vadd.f32 %v263_v33, %v262_v31  ;;  %529 = vlog2.f32 %v257_v32 }
  0x6c   : > { %531 = vlog2.f32 %v264_v34 }
  0x77   : > { %v530_v35 = vpop.eup %529 }
  0x78   : > { %v266_v36 = vmul.f32 0.6931472, %v530_v35 }
  0x79   : > { %v532_v37 = vpop.eup %531 }
  0x7a   : > { %v268_v38 = vmul.f32 0.6931472, %v532_v37  ;;  %v269_v39 = vadd.f32 %v266_v36, %v233_v13 }
  0x7c   : > { %v270_v40 = vadd.f32 %v268_v38, %v240_v15  ;;  %v271_v41 = vsub.f32 %v269_v39, %v221_v0 }
  0x7e   : > { %v272_v42 = vsub.f32 %v270_v40, %v224_v1 }
  0x80   : > { %v275_v44 = vcombine.low %v271_v41, %v272_v42 }
  0x82   : > { %v277_v45 = vmul.f32 %v275_v44, %v222_v43 }
  0x84   : > { %v279_v46 = vcombine.high %v277_v45, %v277_v45  ;;  %v281_v47 = vsel %vm226_vm0, %v277_v45, 0.0 }
  0x85   : > { %v282_v48 = vrot.slane %v281_v47, 4 }
  0x86   : > { %v288_v49 = vsel %vm226_vm0, %v279_v46, 0.0 }
  0x87   : > { %v283_v50 = vadd.f32 %v282_v48, %v281_v47  ;;  %v289_v51 = vrot.slane %v288_v49, 4 }
  0x89   : > { %v284_v52 = vrot.slane %v283_v50, 2  ;;  %v290_v53 = vadd.f32 %v289_v51, %v288_v49 }
  0x8b   : > { %v285_v54 = vadd.f32 %v284_v52, %v283_v50  ;;  %v291_v55 = vrot.slane %v290_v53, 2 }
  0x8d   : > { %v286_v56 = vrot.slane %v285_v54, 1  ;;  %v292_v57 = vadd.f32 %v291_v55, %v290_v53 }
  0x8f   : > { %v287_v58 = vadd.f32 %v286_v56, %v285_v54  ;;  %v293_v59 = vrot.slane %v292_v57, 1 }
  0x91   : > { %v294_v60 = vadd.f32 %v293_v59, %v292_v57  ;;  %v307_v61 = vsel %vm306_vm1, %v287_v58, 0.0 }
  0x93   : > { %v308_v62 = vsel %vm306_vm1, %v294_v60, 0.0 }
  0x94   : > { %v309_v63 = vadd.f32 %v308_v62, %v307_v61 }
  0x96   : > { %310 = vadd.xlane.f32.xlu0 %v309_v63 }
 0x11f   : > { %v311_v0 = vpop.xlane.xlu0 %310 }
 0x120   : > { %v312_v1 = vrot.slane %v311_v0, 4 }
 0x122   : > { %v313_v2 = vadd.f32 %v312_v1, %v311_v0 }
 0x124   : > { %v314_v3 = vrot.slane %v313_v2, 2 }
 0x126   : > { %v315_v4 = vadd.f32 %v314_v3, %v313_v2 }
 0x128   : > { %v316_v5 = vrot.slane %v315_v4, 1 }
 0x12a   : > { %v317_v6 = vadd.f32 %v316_v5, %v315_v4 }
 0x12c   : > { %457 = vpush %v317_v6 }
 0x15d   : > { %s458_s20 = spop %457 }
 0x15e   : > { %v319_v7 = vstv %s458_s20 }
 0x15f   : > { %320 = vst [vmem:[%s218_s21] sm:$0x1] %v319_v7 }
 0x160   : > { %602 = shalt.err (!%p599_p6)
}
 0x161   : > { %s603_s6 = scalar_lea.hbm %s333_s3, 16  ;;  %s607_s27 = scalar_lea.hbm %s872_s2, 32 }
 0x162   : > { %p604_p7 = scmp.ne.s32.totalorder %s333_s3, %s603_s6  ;;  %p608_p4 = scmp.lt.s32.totalorder %s333_s3, %s872_s2 }
 0x163   : > { %p609_p10 = scmp.lt.s32.totalorder %s607_s27, %s603_s6 }
 0x164   : > { %p605_p1 = pnand %p604_p7, %p744_p9 }
 0x165   : > { %p610_p8 = por %p609_p10, %p608_p4 }
 0x166   : > { %p606_p2 = pneg %p605_p1 }
 0x168   : > { %p611_p0 = pnand %p610_p8, %p606_p2 }
 0x16a   : > { %614 = shalt.err (!%p611_p0)
}
 0x16b   : > { %463 = dma.vmem_to_hbm [thread:$0]  (%p744_p9), %s825_s18, 16, %s333_s3, %s322_s7  }
 0x16c PF: > { %s347_s16 = sand.u32 1, %s653_s9   ;;  %p879_p3 = scmp.ge.s32.totalorder %s673_s14, 2 }
 0x16d   : > { %s348_s21 = scalar_lea.sflag [#allocation4], %s347_s16 }
 0x16e   : > { %p473_p13 = pnand %p879_p3, %p751_p11 }
 0x170   : > { %p474_p5 = pneg %p473_p13 }
 0x172   : > { %648 = dma.done.wait (%p474_p5), %s348_s21, 16  }
 0x173   : > { %650 = vsyncadd (%p474_p5), %s348_s21, 4294967280  ;;  %s21_s14 = sadd.s32 1, %s673_s14   ;;  %s880_s9 = smov %s657_s10 }
 0x174   : > { %p18_p12 = scmp.ge.s32.totalorder %s21_s14, 4   ;;  %s881_s10 = smov %s661_s11 }
 0x175   : > { %s882_s11 = smov %s749_s23  ;;  %s883_s12 = smov %s669_s13 }
 0x176   : > { %s884_s13 = smov %s886_s17  ;;  %20 = sbr.rel (!%p18_p12) target bundleno = 8 (0x8), region = 86 }
 0x17b   :  { %352 = vsyncpa [#allocation3], 1 }
 0x17c   :  { %354 = vsyncpa [#allocation3 + $0x1], 1 }
 0x17d   :  { %355 = vsyncpa [#allocation6], 1 }
 0x17e   :  { %357 = vsyncpa [#allocation6 + $0x1], 1 }
 0x17f   :  { %358 = vsyncpa [#allocation4], 1 }
 0x180   :  { %360 = vsyncpa [#allocation4 + $0x1], 1 }

</bundles_post_ra>
